<compile_context>
chip_gen: v6e
topology: v6e:2x2x1
jax: 0.10.0
libtpu: 0.0.40
codegen_flags: <defaults>
</compile_context>

<pallas_src>
import math
import functools

import jax
import jax.numpy as jnp
from jax.experimental import pallas as pl
from jax.experimental.pallas import tpu as pltpu


# ----------------------------------------------------------------------------
# Buffer setup (same formula as the nn.Module: pe is (max_len, 1, d_model))
# ----------------------------------------------------------------------------
def make_positional_encoding(d_model: int, max_len: int) -> jnp.ndarray:
    pos = jnp.arange(max_len, dtype=jnp.float32)[:, None]                    # (L, 1)
    div_term = jnp.exp(
        jnp.arange(0, d_model, 2, dtype=jnp.float32) * (-math.log(10000.0) / d_model)
    )                                                                         # (D/2,)
    ang = pos * div_term                                                      # (L, D/2)
    pe = jnp.stack([jnp.sin(ang), jnp.cos(ang)], axis=-1).reshape(max_len, d_model)
    return pe[:, None, :]                                                     # (L, 1, D)


# ----------------------------------------------------------------------------
# Tiling helpers
# ----------------------------------------------------------------------------
def _choose_tile_s(S: int, B: int, D: int, itemsize: int,
                   target_bytes: int = 6 * 1024 * 1024,
                   min_steps: int = 2) -> int:
    """Largest divisor of S whose (tile_s, B, D) block fits the byte budget.

    Prefers leaving at least `min_steps` grid steps so the parallel S axis can
    be split across both v7x TensorCores.  Degrades gracefully (returns 1 or S)
    instead of failing when S has no convenient divisor.
    """
    row_bytes = max(1, B * D * itemsize)
    cap = max(1, target_bytes // row_bytes)
    divisors = [d for d in range(1, S + 1) if S % d == 0]
    fitting = [d for d in divisors if d <= cap]
    if not fitting:
        return 1
    multi_step = [d for d in fitting if S // d >= min_steps]
    return max(multi_step) if multi_step else max(fitting)


# ----------------------------------------------------------------------------
# Kernels
# ----------------------------------------------------------------------------
def _pe_add_kernel(x_ref, pe_ref, o_ref):
    # x_ref: (tile_s, B, D), pe_ref: (tile_s, 1, D) -> broadcast over batch.
    o_ref[...] = x_ref[...] + pe_ref[...]


def _pe_add_dropout_prng_kernel(seed_ref, x_ref, pe_ref, o_ref, *, threshold, scale):
    # On-chip PRNG, re-seeded per grid step so every tile gets an independent
    # mask regardless of how the parallel grid is split across cores.
    pltpu.prng_seed(seed_ref[0], pl.program_id(0))
    bits = pltpu.bitcast(pltpu.prng_random_bits(x_ref.shape), jnp.int32)
    y = x_ref[...] + pe_ref[...]
    keep = bits >= jnp.int32(threshold)                  # single VPU compare
    o_ref[...] = jnp.where(keep, y * jnp.float32(scale),
                           jnp.zeros_like(y)).astype(o_ref.dtype)


def _pe_add_dropout_bits_kernel(x_ref, pe_ref, bits_ref, o_ref, *, threshold, scale):
    # Fallback path: uint8 bits supplied from the wrapper (interpret / non-TPU).
    y = x_ref[...] + pe_ref[...]
    keep = bits_ref[...] >= jnp.uint8(threshold)
    o_ref[...] = jnp.where(keep, y * jnp.float32(scale),
                           jnp.zeros_like(y)).astype(o_ref.dtype)


# ----------------------------------------------------------------------------
# Wrapper
# ----------------------------------------------------------------------------
def positional_encoding_forward(x, pe, *, dropout_p=0.1, train=False, rng=None,
                                tile_s=None, use_host_bits=None):
    """x: (S, B, D), pe: (max_len, 1, D).  Returns dropout(x + pe[:S])."""
    S, B, D = x.shape
    assert pe.shape[0] >= S and pe.shape[-1] == D
    assert 0.0 <= dropout_p < 1.0, "dropout_p must be in [0, 1)"

    if tile_s is None:
        tile_s = _choose_tile_s(S, B, D, jnp.dtype(x.dtype).itemsize)
    assert S % tile_s == 0, "tile_s must divide S"
    grid = (S // tile_s,)

    # Native-layout blocks: trailing dims (B, D) are the FULL array dims, so no
    # (8,128) issues even for small B, and the output is lane-dense in D.
    x_spec = pl.BlockSpec((tile_s, B, D), lambda i, *_: (i, 0, 0))
    pe_spec = pl.BlockSpec((tile_s, 1, D), lambda i, *_: (i, 0, 0))
    out_spec = pl.BlockSpec((tile_s, B, D), lambda i, *_: (i, 0, 0))
    out_shape = jax.ShapeDtypeStruct((S, B, D), x.dtype)

    cparams = pltpu.CompilerParams(
        dimension_semantics=("parallel",),      # v7x: shard S-steps over 2 TCs
        vmem_limit_bytes=48 * 1024 * 1024,      # raise v5e/v6e scoped limit,
                                                # leave headroom on v7x (64 MiB)
    )

    # ---- eval / p == 0: plain add ------------------------------------------
    if (not train) or dropout_p == 0.0:
        return pl.pallas_call(
            _pe_add_kernel,
            out_shape=out_shape,
            grid_spec=pltpu.PrefetchScalarGridSpec(
                num_scalar_prefetch=0, grid=grid,
                in_specs=[x_spec, pe_spec], out_specs=out_spec),
            compiler_params=cparams,
        )(x, pe)

    # ---- training: add + dropout -------------------------------------------
    if rng is None:
        rng = jax.random.PRNGKey(0)
    scale = 1.0 / (1.0 - dropout_p)

    if use_host_bits is None:
        # On-chip PRNG only lowers on real TPU; fall back elsewhere.
        use_host_bits = jax.devices()[0].platform != "tpu"

    if not use_host_bits:
        # No dropout-bits HBM stream at all: bits are drawn on-chip.
        seed = jax.random.randint(rng, (1,), 0, 2**31 - 1, dtype=jnp.int32)
        # bits ~ uniform int32 over [-2^31, 2^31); keep iff bits >= t gives
        # P(keep) = 1 - p with t = round(p * 2^32) - 2^31.
        t = int(round(dropout_p * float(1 << 32))) - (1 << 31)
        threshold = max(-(1 << 31), min(t, (1 << 31) - 1))
        return pl.pallas_call(
            functools.partial(_pe_add_dropout_prng_kernel,
                              threshold=threshold, scale=scale),
            out_shape=out_shape,
            grid_spec=pltpu.PrefetchScalarGridSpec(
                num_scalar_prefetch=1, grid=grid,
                in_specs=[x_spec, pe_spec], out_specs=out_spec),
            compiler_params=cparams,
        )(seed, x, pe)

    # Fallback: uint8 bits generated directly in the native layout (no
    # transpose, 4x less traffic than int32).  Dropout prob quantized to 1/256.
    bits = jax.random.bits(rng, (S, B, D), dtype=jnp.uint8)
    threshold = min(int(round(dropout_p * 256.0)), 255)
    bits_spec = pl.BlockSpec((tile_s, B, D), lambda i, *_: (i, 0, 0))
    return pl.pallas_call(
        functools.partial(_pe_add_dropout_bits_kernel,
                          threshold=threshold, scale=scale),
        out_shape=out_shape,
        grid_spec=pltpu.PrefetchScalarGridSpec(
            num_scalar_prefetch=0, grid=grid,
            in_specs=[x_spec, pe_spec, bits_spec], out_specs=out_spec),
        compiler_params=cparams,
    )(x, pe, bits)


# ----------------------------------------------------------------------------
# Demo / check
# ----------------------------------------------------------------------------
if __name__ == "__main__":
    d_model = 32
    max_len = 64
    seq, batch = 8, 2
    p = 0.1

    pe = make_positional_encoding(d_model, max_len)

    key = jax.random.PRNGKey(0)
    kx, kd = jax.random.split(key)
    x = jax.random.normal(kx, (seq, batch, d_model), dtype=jnp.float32)

    # --- eval-mode forward (dropout = identity), checked vs pure-JAX ref ----
    y = jax.block_until_ready(
        positional_encoding_forward(x, pe, dropout_p=p, train=False))
    y_ref = x + pe[:seq]
    assert y.shape == (seq, batch, d_model)
    assert jnp.allclose(y, y_ref, atol=1e-6), "eval-mode mismatch vs reference"

    # --- train-mode forward --------------------------------------------------
    # The mask is drawn on-chip, so we check the two invariants of dropout:
    #   (a) every surviving element equals (x + pe) / (1 - p)
    #   (b) the dropped fraction is statistically consistent with p
    y_tr = jax.block_until_ready(
        positional_encoding_forward(x, pe, dropout_p=p, train=True, rng=kd))
    scaled_ref = y_ref / (1.0 - p)
    dropped = (y_tr == 0.0)
    kept_ok = jnp.where(dropped, True, jnp.isclose(y_tr, scaled_ref, atol=1e-5))
    assert bool(jnp.all(kept_ok)), "train-mode surviving values mismatch"
    drop_frac = float(jnp.mean(dropped.astype(jnp.float32)))
    assert abs(drop_frac - p) < 0.08, (
        f"train-mode drop fraction {drop_frac:.3f} far from p={p}")

    print("KERNEL_OK")
</pallas_src>

<mosaic_0001>
module attributes {stable_mosaic.version = 11 : i64} {
  func.func @_pe_add_kernel(%arg0: i32, %arg1: memref<4x2x32xf32, #tpu.memory_space<vmem>>, %arg2: memref<4x1x32xf32, #tpu.memory_space<vmem>>, %arg3: memref<4x2x32xf32, #tpu.memory_space<vmem>>) attributes {dimension_semantics = [#tpu.dimension_semantics<parallel>], iteration_bounds = array<i64: 2>, scalar_prefetch = 0 : i64, scratch_operands = 0 : i64, tpu.core_type = #tpu.core_type<tc>, window_params = [{transform_indices = @transform_0, window_bounds = array<i64: 4, 2, 32>}, {transform_indices = @transform_1, window_bounds = array<i64: 4, 1, 32>}, {transform_indices = @transform_2, window_bounds = array<i64: 4, 2, 32>}]} {
    %c0 = arith.constant 0 : index
    %c0_0 = arith.constant 0 : index
    %c0_1 = arith.constant 0 : index
    %0 = vector.load %arg1[%c0, %c0_0, %c0_1] : memref<4x2x32xf32, #tpu.memory_space<vmem>>, vector<4x2x32xf32>
    %c0_2 = arith.constant 0 : index
    %c0_3 = arith.constant 0 : index
    %c0_4 = arith.constant 0 : index
    %1 = vector.load %arg2[%c0_2, %c0_3, %c0_4] : memref<4x1x32xf32, #tpu.memory_space<vmem>>, vector<4x1x32xf32>
    %2 = vector.broadcast %1 : vector<4x1x32xf32> to vector<4x2x32xf32>
    %3 = arith.addf %0, %2 : vector<4x2x32xf32>
    %c0_5 = arith.constant 0 : index
    %c0_6 = arith.constant 0 : index
    %c0_7 = arith.constant 0 : index
    %4 = vector.load %arg3[%c0_5, %c0_6, %c0_7] : memref<4x2x32xf32, #tpu.memory_space<vmem>>, vector<4x2x32xf32>
    tpu.vector_store %arg3[%c0_5, %c0_6, %c0_7], %3 {strides = array<i32>} : memref<4x2x32xf32, #tpu.memory_space<vmem>>, vector<4x2x32xf32>,
    return
  }
  func.func @transform_0(%arg0: i32) -> (i32, i32, i32) {
    %c0_i32 = arith.constant 0 : i32
    %c0_i32_0 = arith.constant 0 : i32
    %c0_i32_1 = arith.constant 0 : i32
    return %arg0, %c0_i32, %c0_i32_0 : i32, i32, i32
  }
  func.func @transform_1(%arg0: i32) -> (i32, i32, i32) {
    %c0_i32 = arith.constant 0 : i32
    %c0_i32_0 = arith.constant 0 : i32
    %c0_i32_1 = arith.constant 0 : i32
    return %arg0, %c0_i32, %c0_i32_0 : i32, i32, i32
  }
  func.func @transform_2(%arg0: i32) -> (i32, i32, i32) {
    %c0_i32 = arith.constant 0 : i32
    %c0_i32_0 = arith.constant 0 : i32
    %c0_i32_1 = arith.constant 0 : i32
    return %arg0, %c0_i32, %c0_i32_0 : i32, i32, i32
  }
}

</mosaic_0001>

<bundles_post_ra>
// kernel: tpu_custom_call.1
= control target key start
LH: loop header
LB: loop body
LE: loop exit
PB: predicated region body
PF: predicated region fallthrough
CT: control target
= control target key end

     0   :  { %7 = vsyncpa [#allocation3], 0  ;;  %s541_s0 = inlined_call_operand.vmem [shape: f32[8,2,32], index: 0, kind: input, shape index: {}]   ;;  %s542_s1 = inlined_call_operand.vmem [shape: f32[64,1,32], index: 1, kind: input, shape index: {}]   ;;  %s543_s2 = inlined_call_operand.hbm [shape: f32[8,2,32], index: 2, kind: output, shape index: {}]  }
   0x1   :  { %9 = vsyncpa [#allocation3 + $0x1], 0  ;;  %s429_s9 = smov 0   ;;  %s431_s10 = smov 0  }
   0x2   :  { %s433_s11 = smov 0   ;;  %s435_s12 = smov 0  }
   0x3 LB: > { %s450_s13 = sadd.s32 4294967295, %s409_s12   ;;  %s290_s14 = sadd.s32 4294967294, %s409_s12   ;;  %s409_s12 = sphi %s435_s12, %s549_s12   ;;  %s405_s11 = sphi %s433_s11, %s548_s11   ;;  %s401_s10 = sphi %s431_s10, %s547_s10   ;;  %s397_s9 = sphi %s429_s9, %s546_s9  }
   0x4   : > { %s454_s15 = sadd.s32 1, %s409_s12   ;;  %s74_s16 = sadd.s32 1, %s405_s11 }
   0x5   : > { %s71_s17 = ssub.s32 %s409_s12, %s454_s15  ;;  %p84_p0 = scmp.ne.s32.totalorder %s405_s11, %s401_s10 }
   0x6   : > { %p72_p1 = scmp.eq.s32.totalorder %s71_s17, 0  ;;  %p85_p2 = scmp.eq.s32.totalorder %s450_s13, 1 }
   0x7   : > { %p90_p3 = scmp.ne.s32.totalorder %s401_s10, %s397_s9  ;;  %p91_p4 = scmp.eq.s32.totalorder %s290_s14, 1 }
   0x8   : > { %s465_s18 = scalar_select %p72_p1, %s405_s11, %s74_s16  }
   0x9   : > { %p467_p5 = por %p85_p2, %p84_p0  ;;  %p471_p6 = por %p91_p4, %p90_p3 }
   0xa   : > { %p293_p7 = scmp.ge.s32.totalorder %s409_s12, 1  ;;  %p126_p8 = scmp.lt.s32.totalorder %s409_s12, 3 }
   0xc   : > { %p127_p9 = pnand %p293_p7, %p126_p8 }
   0xd   : > { %s149_s21 = sand.u32 (!%p127_p9), 1, %s401_s10   ;;  %s295_s22 = sshll.u32 (!%p127_p9), %s450_s13, 2 }
   0xe   : > { %130 = sbr.rel (%p127_p9) target bundleno = 46 (0x2e), region = 28  ;;  %s294_s23 = sshll.u32 (!%p127_p9), %s149_s21, 3 }
   0xf   : > { %p153_p10 = scmp.lt.s32.totalorder (!%p127_p9), %s295_s22, 7  ;;  %p159_p11 = scmp.lt.s32.totalorder (!%p127_p9), %s295_s22, 63 }
  0x10   : > { %s151_s4 = scalar_lea.vmem (!%p127_p9), [#allocation2], %s294_s23  ;;  %s307_s6 = sshll.u32 (!%p127_p9), %s450_s13, 7 }
  0x11   : > { %s219_s5 = sshll.u32 (!%p127_p9), %s151_s4, 4  ;;  %s493_s14 = scalar_lea.hbm (!%p127_p9), %s543_s2, %s307_s6  ;;  %s488_s5 = int_to_ptr.vmem [resolvable:$true] %s219_s5 }
  0x12   : > { %s501_s13 = scalar_lea.sflag (!%p127_p9), [#allocation3], %s149_s21  ;;  %s349_s16 = scalar_lea.vmem (!%p127_p9), %s488_s5, 128 }
  0x13   : > { %s154_s24 = scalar_select %p153_p10, %s295_s22, 7  ;;  %vm200_vm0 = vcmask 254976  }
  0x14   : > { %s551_s22 = smov (!%p159_p11, %s295_s22), 63  ;;  %p350_p12 = scmp.ne.s32.totalorder %s488_s5, %s349_s16 }
  0x15   : > { %s296_s25 = sshll.u32 %s154_s24, 1  ;;  %s161_s3 = scalar_lea.vmem %s542_s1, %s551_s22 }
  0x16   : > { %s156_s28 = scalar_lea.vmem %s541_s0, %s296_s25  ;;  %v298_v1 = vld [vmem:[%s161_s3] ss:$0 sm:$0xff]  ;;  %v299_v4 = vld [vmem:[%s161_s3 + $0x1] ss:$0 sm:$0xff]  ;;  %v300_v7 = vld [vmem:[%s161_s3 + $0x2] ss:$0 sm:$0xff]  ;;  %p351_p13 = pnand %p350_p12, %p467_p5 }
  0x17   : > { %v164_v0 = vld [vmem:[%s156_s28] sm:$0x3]  ;;  %v165_v3 = vld [vmem:[%s156_s28 + $0x2] sm:$0x3]  ;;  %v166_v5 = vld [vmem:[%s156_s28 + $0x4] sm:$0x3] }
  0x18   : > { %v196_v2 = vadd.f32 %v298_v1, %v164_v0  ;;  %v197_v6 = vadd.f32 %v299_v4, %v165_v3  ;;  %v167_v8 = vld [vmem:[%s156_s28 + $0x6] sm:$0x3]  ;;  %v301_v9 = vld [vmem:[%s161_s3 + $0x3] ss:$0 sm:$0xff]  ;;  %v198_v10 = vadd.f32 %v300_v7, %v166_v5  ;;  %p352_p0 = pneg %p351_p13  ;;  %s411_s17 = smov [#allocation2]  }
  0x19   : > { %v199_v11 = vadd.f32 %v301_v9, %v167_v8  ;;  %s353_s22 = sshll.u32 %s411_s17, 4  ;;  %s354_s22 = int_to_ptr.vmem [resolvable:$false] %s353_s22 }
  0x1a   : > { %201 = vst.msk [vmem:[%s151_s4] sm:$0x3] %vm200_vm0, %v196_v2  ;;  %202 = vst.msk [vmem:[%s151_s4 + $0x2] sm:$0x3] %vm200_vm0, %v197_v6  ;;  %s355_s23 = scalar_lea.vmem %s354_s22, 256  ;;  %p356_p1 = scmp.lt.s32.totalorder %s488_s5, %s354_s22 }
  0x1b   : > { %203 = vst.msk [vmem:[%s151_s4 + $0x4] sm:$0x3] %vm200_vm0, %v198_v10  ;;  %204 = vst.msk [vmem:[%s151_s4 + $0x6] sm:$0x3] %vm200_vm0, %v199_v11  ;;  %p357_p2 = scmp.lt.s32.totalorder %s355_s23, %s349_s16 }
  0x1d   : > { %p358_p3 = por %p357_p2, %p356_p1 }
  0x1f   : > { %p359_p4 = pnand %p358_p3, %p352_p0 }
  0x21   : > { %362 = shalt.err (!%p359_p4)
}
  0x22   : > { %s363_s21 = scalar_lea.hbm %s493_s14, 128  ;;  %s367_s26 = scalar_lea.hbm %s543_s2, 256 }
  0x23   : > { %p364_p7 = scmp.ne.s32.totalorder %s493_s14, %s363_s21  ;;  %p368_p10 = scmp.lt.s32.totalorder %s493_s14, %s543_s2 }
  0x24   : > { %p369_p11 = scmp.lt.s32.totalorder %s367_s26, %s363_s21 }
  0x25   : > { %p365_p8 = pnand %p364_p7, %p467_p5 }
  0x26   : > { %p370_p12 = por %p369_p11, %p368_p10 }
  0x27   : > { %p366_p9 = pneg %p365_p8 }
  0x29   : > { %p371_p13 = pnand %p370_p12, %p366_p9 }
  0x2b   : > { %374 = shalt.err (!%p371_p13)
}
  0x2c   : > { %s412_s29 = smov 32   ;;  %s413_s30 = smov 2  }
  0x2d   : > { %308 = dma.vmem_to_hbm [thread:$0]  (%p467_p5), %s488_s5, 128, %s493_s14, %s501_s13, %s412_s29, %s412_s29, %s413_s30  }
  0x2e PF: > { %p314_p0 = scmp.ge.s32.totalorder %s409_s12, 2  ;;  %s234_s3 = sand.u32 1, %s397_s9  }
  0x2f   : > { %s235_s4 = scalar_lea.sflag [#allocation3], %s234_s3 }
  0x30   : > { %p311_p1 = pnand %p314_p0, %p471_p6 }
  0x32   : > { %p312_p2 = pneg %p311_p1 }
  0x34   : > { %392 = dma.done.wait (%p312_p2), %s235_s4, 128  }
  0x35   : > { %394 = vsyncadd (%p312_p2), %s235_s4, 4294967168  ;;  %p12_p3 = scmp.ge.s32.totalorder %s454_s15, 4   ;;  %s546_s9 = smov %s401_s10 }
  0x36   : > { %s547_s10 = smov %s405_s11  ;;  %s548_s11 = smov %s465_s18 }
  0x37   : > { %s549_s12 = smov %s454_s15  ;;  %14 = sbr.rel (!%p12_p3) target bundleno = 3 (0x3), region = 66 }
  0x3c   :  { %240 = vsyncpa [#allocation3], 1 }
  0x3d   :  { %242 = vsyncpa [#allocation3 + $0x1], 1 }

</bundles_post_ra>
